<compile_context>
chip_gen: v7x
topology: tpu7x:2x2x1
jax: 0.10.0
libtpu: 0.0.40
codegen_flags: <defaults>
</compile_context>

<pallas_src>
import functools

import jax
import jax.numpy as jnp
import numpy as np
from jax import lax
from jax.experimental import pallas as pl
from jax.experimental.pallas import tpu as pltpu

_HW = 128  # halo width (one 128-lane block); covers `padding` and 2*dilated


def _round_up(x, m):
    return (x + m - 1) // m * m


def _vmem_capacity_bytes():
    try:
        info = pltpu.get_tpu_info()
        cap = getattr(info, "vmem_capacity_bytes", None)
        if cap:
            return int(cap)
    except Exception:
        pass
    return 64 * 1024 * 1024  # conservative default (v7x)


def _auto_t_tile(cin, cp, T, in_bytes, out_bytes, budget):
    """Largest time tile whose estimated live set fits the VMEM budget."""
    t_max = _round_up(max(T, 128), 128)
    for cand in (2048, 1024, 512, 256, 128):
        tt = min(cand, t_max)
        ext = tt + 2 * _HW
        est = (2 * cin * ext * in_bytes      # double-buffered input blocks
               + 2 * cp * tt * out_bytes     # double-buffered output block
               + 3 * cp * ext * 4            # qkv scratch (f32)
               + 10 * cp * tt * 4            # elementwise temporaries (f32)
               + 3 * cp * cin * in_bytes)    # weights
        if est <= budget:
            return tt
    return 128


def _dal_kernel(xl_ref, x_ref, xr_ref, w_ref, rel_ref, o_ref, qkv_ref, *,
                padding, dilated, cp, t_tile, seq_len, time_axis):
    # xl_ref : (1, Cin, 128)       left halo block of x  (clamped at tile 0)
    # x_ref  : (1, Cin, t_tile)    main time tile of x
    # xr_ref : (1, Cin, 128)       right halo block of x (clamped on last tile)
    # w_ref  : (3*Cp, Cin)         fused [Wq; Wk; Wv], matmul-ready
    # rel_ref: (Cp, 3)             rel_t positional bias
    # o_ref  : (1, Cp, t_tile)
    # qkv_ref: (3*Cp, t_tile+256)  f32 scratch: QKV over the halo-extended tile
    ext_w = t_tile + 2 * _HW
    i = pl.program_id(time_axis)
    w = w_ref[...]

    # Fused QKV matmuls straight into the scratch -- no activation staging.
    qkv_ref[:, _HW:_HW + t_tile] = jnp.dot(
        w, x_ref[0], preferred_element_type=jnp.float32)
    qkv_ref[:, _HW + t_tile:] = jnp.dot(
        w, xr_ref[0], preferred_element_type=jnp.float32)

    @pl.when(i > 0)
    def _():
        qkv_ref[:, :_HW] = jnp.dot(w, xl_ref[0],
                                   preferred_element_type=jnp.float32)

    @pl.when(i == 0)
    def _():
        # x positions < 0: the conv's left zero padding (bias=False -> conv(0)=0).
        qkv_ref[:, :_HW] = jnp.zeros((3 * cp, _HW), jnp.float32)

    # x positions >= T: the conv's right zero padding.  Also zeroes the clamped
    # right-halo block and the ragged tail of the last main block.
    @pl.when((i + 1) * t_tile + _HW > seq_len)
    def _():
        pos = (i * t_tile - _HW) + lax.broadcasted_iota(jnp.int32, (1, ext_w), 1)
        qkv_ref[...] = jnp.where(pos < seq_len, qkv_ref[...], 0.0)

    def tap(a, shift):
        # result[:, l] = a[:, l + shift]   (static 0 <= shift <= 256)
        if shift == 0:
            return a[:, :t_tile]
        r = pltpu.roll(a, shift=(-shift) % ext_w, axis=1)
        return r[:, :t_tile]

    # Output time t (local lane l) reads x position t + off; in the extended
    # coordinate that is lane l + off + 128.
    q = qkv_ref[0:cp, _HW:_HW + t_tile]          # lane-aligned slice: no roll
    k_e = qkv_ref[cp:2 * cp, :]
    sh = [_HW + j * dilated - padding for j in range(3)]

    s0 = q * tap(k_e, sh[0])
    s1 = q * tap(k_e, sh[1])
    s2 = q * tap(k_e, sh[2])
    m = jnp.maximum(jnp.maximum(s0, s1), s2)

    v_e = qkv_ref[2 * cp:3 * cp, :]
    rel = rel_ref[...]

    # Tap-by-tap softmax accumulation (few simultaneously-live arrays).
    e = jnp.exp(s0 - m)
    den = e
    num = e * (tap(v_e, sh[0]) + rel[:, 0:1])
    e = jnp.exp(s1 - m)
    den = den + e
    num = num + e * (tap(v_e, sh[1]) + rel[:, 1:2])
    e = jnp.exp(s2 - m)
    den = den + e
    num = num + e * (tap(v_e, sh[2]) + rel[:, 2:3])

    # EUP approximate reciprocal (den in [1, 3]); no Newton step -- the 3-tap
    # softmax tolerates the approx error and it keeps the VALU path short.
    inv = pl.reciprocal(den, approx=True)
    o_ref[0] = (num * inv).astype(o_ref.dtype)


def dal_forward(x_nct, wq, wk, wv, rel_t, *, padding=1, dilated=1,
                t_tile=None, matmul_dtype=jnp.bfloat16, out_dtype=jnp.float32):
    """Forward of PDAN's DAL (stride=1).  x_nct: (B, Cin, T); wq/wk/wv:
    (Cout, Cin); rel_t: (Cout, 1, 3).  Returns (B, Cout, T) in `out_dtype`."""
    B, Cin, T = x_nct.shape
    Cout = wq.shape[0]
    assert 0 <= padding <= _HW and 0 < 2 * dilated <= _HW, (
        "kernel supports padding <= 128 and 2*dilated <= 128")

    in_bytes = jnp.dtype(matmul_dtype).itemsize
    out_bytes = jnp.dtype(out_dtype).itemsize

    # Pad Cout to a sublane multiple only when necessary (avoids output slice).
    Cp = Cout if Cout % 8 == 0 else _round_up(Cout, 8)

    cap = _vmem_capacity_bytes()
    vmem_limit = min(cap * 3 // 4, 112 * 1024 * 1024)
    if t_tile is None:
        t_tile = _auto_t_tile(Cin, Cp, T, in_bytes, out_bytes,
                              int(vmem_limit * 0.9))
    else:
        t_tile = _round_up(max(128, int(t_tile)), 128)
        t_tile = min(t_tile, _round_up(T, 128))

    n_t = -(-T // t_tile)
    hb = t_tile // 128
    n128 = -(-T // 128)

    # No zero-padded HBM copy of x; only a dtype cast (ideally producer-side).
    x_c = x_nct if x_nct.dtype == matmul_dtype else x_nct.astype(matmul_dtype)

    w_qkv = jnp.stack([wq, wk, wv], axis=0).astype(jnp.float32)  # (3, Cout, Cin)
    rel = rel_t.reshape(Cout, 3).astype(jnp.float32)
    if Cp != Cout:
        # Keep these pads coupled: zero weight rows must pair with zero rel rows.
        w_qkv = jnp.pad(w_qkv, ((0, 0), (0, Cp - Cout), (0, 0)))
        rel = jnp.pad(rel, ((0, Cp - Cout), (0, 0)))
    w_qkv = w_qkv.reshape(3 * Cp, Cin).astype(matmul_dtype)

    # Put the larger extent first so v7x's two TensorCores split it evenly.
    if n_t >= B:
        grid = (n_t, B)
        time_axis = 0
        def _bt(g0, g1):
            return g1, g0
    else:
        grid = (B, n_t)
        time_axis = 1
        def _bt(g0, g1):
            return g0, g1

    def im_left(g0, g1):
        b, t = _bt(g0, g1)
        return (b, 0, jnp.maximum(t * hb - 1, 0))

    def im_main(g0, g1):
        b, t = _bt(g0, g1)
        return (b, 0, t)

    def im_right(g0, g1):
        b, t = _bt(g0, g1)
        return (b, 0, jnp.minimum((t + 1) * hb, n128 - 1))

    def im_const(g0, g1):
        return (0, 0)

    kernel = functools.partial(
        _dal_kernel, padding=padding, dilated=dilated, cp=Cp,
        t_tile=t_tile, seq_len=T, time_axis=time_axis)

    ext_w = t_tile + 2 * _HW
    steps = B * n_t
    cost = pl.CostEstimate(
        flops=int(2 * (3 * Cp) * Cin * ext_w * steps),
        transcendentals=int(3 * Cp * t_tile * steps),
        bytes_accessed=int(Cin * ext_w * in_bytes * steps
                           + Cp * t_tile * out_bytes * steps
                           + 3 * Cp * Cin * in_bytes),
    )

    out = pl.pallas_call(
        kernel,
        out_shape=jax.ShapeDtypeStruct((B, Cp, T), out_dtype),
        grid=grid,
        in_specs=[
            pl.BlockSpec((1, Cin, _HW), im_left),
            pl.BlockSpec((1, Cin, t_tile), im_main),
            pl.BlockSpec((1, Cin, _HW), im_right),
            pl.BlockSpec((3 * Cp, Cin), im_const),
            pl.BlockSpec((Cp, 3), im_const),
        ],
        out_specs=pl.BlockSpec((1, Cp, t_tile), im_main),
        scratch_shapes=[pltpu.VMEM((3 * Cp, ext_w), jnp.float32)],
        compiler_params=pltpu.CompilerParams(
            dimension_semantics=("parallel", "parallel"),
            vmem_limit_bytes=int(vmem_limit),
        ),
        cost_estimate=cost,
    )(x_c, x_c, x_c, w_qkv, rel)

    if Cp != Cout:
        out = out[:, :Cout, :]
    return out


def dal_reference(x, wq, wk, wv, rel_t, *, padding=1, dilated=1):
    """Pure-JAX replica of the PyTorch forward (NCT layout) for verification."""
    B, Cin, T = x.shape
    q = jnp.einsum('oi,bit->bot', wq, x)                        # (B, Cout, T)
    xp = jnp.pad(x, ((0, 0), (0, 0), (padding, padding)))
    k = jnp.einsum('oi,bit->bot', wk, xp)                       # (B, Cout, T+2p)
    v = jnp.einsum('oi,bit->bot', wv, xp)
    offs = [0, dilated, 2 * dilated]
    k_w = jnp.stack([k[:, :, o:o + T] for o in offs], axis=-1)  # (B, Cout, T, 3)
    v_w = jnp.stack([v[:, :, o:o + T] for o in offs], axis=-1)
    v_w = v_w + rel_t[None, :, :, :]                            # rel_t: (Cout,1,3)
    scores = q[..., None] * k_w
    attn = jax.nn.softmax(scores, axis=-1)
    return jnp.einsum('bctk,bctk->bct', attn, v_w)              # (B, Cout, T)


if __name__ == "__main__":
    key = jax.random.PRNGKey(0)

    def make_inputs(k, B, Cin, Cout, T):
        kx, kq, kk, kv, kr = jax.random.split(k, 5)
        x = jax.random.normal(kx, (B, Cin, T), dtype=jnp.float32)
        # kaiming_normal_(mode='fan_out') for Conv1d(Cin, Cout, 1): std=sqrt(2/Cout)
        std = float(np.sqrt(2.0 / Cout))
        wq = jax.random.normal(kq, (Cout, Cin), dtype=jnp.float32) * std
        wk = jax.random.normal(kk, (Cout, Cin), dtype=jnp.float32) * std
        wv = jax.random.normal(kv, (Cout, Cin), dtype=jnp.float32) * std
        rel_t = jax.random.normal(kr, (Cout, 1, 3), dtype=jnp.float32)
        return x, wq, wk, wv, rel_t

    def rbf16(a):
        return a.astype(jnp.bfloat16).astype(jnp.float32)

    k1, k2, k3 = jax.random.split(key, 3)

    # 1) Module defaults (kernel_size=3, stride=1, padding=1, dilated=1), f32 path.
    x, wq, wk, wv, rel_t = make_inputs(k1, 2, 16, 32, 256)
    out = jax.block_until_ready(dal_forward(
        x, wq, wk, wv, rel_t, padding=1, dilated=1, matmul_dtype=jnp.float32))
    ref = dal_reference(x, wq, wk, wv, rel_t, padding=1, dilated=1)
    np.testing.assert_allclose(np.asarray(out), np.asarray(ref),
                               rtol=2e-2, atol=2e-2)

    # 2) Multi-tile time axis (left/right halos, ragged tail), dilation 2,
    #    Cout not a multiple of 8 (exercises the channel-pad path), f32 path.
    x, wq, wk, wv, rel_t = make_inputs(k2, 2, 16, 20, 300)
    out = jax.block_until_ready(dal_forward(
        x, wq, wk, wv, rel_t, padding=2, dilated=2, t_tile=128,
        matmul_dtype=jnp.float32))
    ref = dal_reference(x, wq, wk, wv, rel_t, padding=2, dilated=2)
    np.testing.assert_allclose(np.asarray(out), np.asarray(ref),
                               rtol=2e-2, atol=2e-2)

    # 3) Default bf16 matmul path (f32 accumulation), checked against a
    #    reference run on bf16-rounded inputs.
    x, wq, wk, wv, rel_t = make_inputs(k3, 2, 16, 32, 300)
    out = jax.block_until_ready(dal_forward(x, wq, wk, wv, rel_t,
                                            padding=1, dilated=1))
    ref = dal_reference(rbf16(x), rbf16(wq), rbf16(wk), rbf16(wv), rel_t,
                        padding=1, dilated=1)
    np.testing.assert_allclose(np.asarray(out), np.asarray(ref),
                               rtol=3e-2, atol=3e-2)

    print("KERNEL_OK")
</pallas_src>

<mosaic_0001>
module attributes {stable_mosaic.version = 11 : i64} {
  func.func @_dal_kernel(%arg0: i32, %arg1: i32, %arg2: memref<1x16x128xf32, #tpu.memory_space<vmem>>, %arg3: memref<1x16x256xf32, #tpu.memory_space<vmem>>, %arg4: memref<1x16x128xf32, #tpu.memory_space<vmem>>, %arg5: memref<96x16xf32, #tpu.memory_space<vmem>>, %arg6: memref<32x3xf32, #tpu.memory_space<vmem>>, %arg7: memref<1x32x256xf32, #tpu.memory_space<vmem>>, %arg8: memref<96x512xf32, #tpu.memory_space<vmem>>) attributes {dimension_semantics = [#tpu.dimension_semantics<parallel>, #tpu.dimension_semantics<parallel>], iteration_bounds = array<i64: 2, 1>, scalar_prefetch = 0 : i64, scratch_operands = 1 : i64, tpu.core_type = #tpu.core_type<tc>, window_params = [{transform_indices = @transform_0, window_bounds = array<i64: 1, 16, 128>}, {transform_indices = @transform_1, window_bounds = array<i64: 1, 16, 256>}, {transform_indices = @transform_2, window_bounds = array<i64: 1, 16, 128>}, {pipeline_mode = #tpu.pipeline_mode<synchronous>, transform_indices = @transform_3, window_bounds = array<i64: 96, 16>}, {pipeline_mode = #tpu.pipeline_mode<synchronous>, transform_indices = @transform_4, window_bounds = array<i64: 32, 3>}, {transform_indices = @transform_5, window_bounds = array<i64: 1, 32, 256>}]} {
    %c0 = arith.constant 0 : index
    %c0_0 = arith.constant 0 : index
    %0 = vector.load %arg5[%c0, %c0_0] : memref<96x16xf32, #tpu.memory_space<vmem>>, vector<96x16xf32>
    %c0_1 = arith.constant 0 : index
    %c0_2 = arith.constant 0 : index
    %c0_3 = arith.constant 0 : index
    %1 = vector.load %arg3[%c0_1, %c0_2, %c0_3] : memref<1x16x256xf32, #tpu.memory_space<vmem>>, vector<1x16x256xf32>
    %2 = vector.shape_cast %1 : vector<1x16x256xf32> to vector<16x256xf32>
    %cst = arith.constant dense<0.000000e+00> : vector<96x256xf32>
    %3 = tpu.matmul %0, %2, %cst {dimension_numbers = #tpu.dot_dimension_numbers<[1], [0], [0], [1], [0, 0, 1, 1], [], []>} : vector<96x16xf32>, vector<16x256xf32>, vector<96x256xf32> -> vector<96x256xf32>
    %c0_4 = arith.constant 0 : index
    %c128 = arith.constant 128 : index
    %4 = vector.load %arg8[%c0_4, %c128] : memref<96x512xf32, #tpu.memory_space<vmem>>, vector<96x256xf32>
    tpu.vector_store %arg8[%c0_4, %c128], %3 {strides = array<i32>} : memref<96x512xf32, #tpu.memory_space<vmem>>, vector<96x256xf32>,
    %c0_5 = arith.constant 0 : index
    %c0_6 = arith.constant 0 : index
    %c0_7 = arith.constant 0 : index
    %5 = vector.load %arg4[%c0_5, %c0_6, %c0_7] : memref<1x16x128xf32, #tpu.memory_space<vmem>>, vector<1x16x128xf32>
    %6 = vector.shape_cast %5 : vector<1x16x128xf32> to vector<16x128xf32>
    %cst_8 = arith.constant dense<0.000000e+00> : vector<96x128xf32>
    %7 = tpu.matmul %0, %6, %cst_8 {dimension_numbers = #tpu.dot_dimension_numbers<[1], [0], [0], [1], [0, 0, 1, 1], [], []>} : vector<96x16xf32>, vector<16x128xf32>, vector<96x128xf32> -> vector<96x128xf32>
    %c0_9 = arith.constant 0 : index
    %c384 = arith.constant 384 : index
    %8 = vector.load %arg8[%c0_9, %c384] : memref<96x512xf32, #tpu.memory_space<vmem>>, vector<96x128xf32>
    tpu.vector_store %arg8[%c0_9, %c384], %7 {strides = array<i32>} : memref<96x512xf32, #tpu.memory_space<vmem>>, vector<96x128xf32>,
    %c0_i32 = arith.constant 0 : i32
    %9 = arith.cmpi sgt, %arg1, %c0_i32 : i32
    %10 = arith.extui %9 : i1 to i32
    %c0_i32_10 = arith.constant 0 : i32
    %11 = arith.cmpi ne, %10, %c0_i32_10 : i32
    scf.if %11 {
      %c0_27 = arith.constant 0 : index
      %c0_28 = arith.constant 0 : index
      %c0_29 = arith.constant 0 : index
      %69 = vector.load %arg2[%c0_27, %c0_28, %c0_29] : memref<1x16x128xf32, #tpu.memory_space<vmem>>, vector<1x16x128xf32>
      %70 = vector.shape_cast %69 : vector<1x16x128xf32> to vector<16x128xf32>
      %cst_30 = arith.constant dense<0.000000e+00> : vector<96x128xf32>
      %71 = tpu.matmul %0, %70, %cst_30 {dimension_numbers = #tpu.dot_dimension_numbers<[1], [0], [0], [1], [0, 0, 1, 1], [], []>} : vector<96x16xf32>, vector<16x128xf32>, vector<96x128xf32> -> vector<96x128xf32>
      %c0_31 = arith.constant 0 : index
      %c0_32 = arith.constant 0 : index
      %72 = vector.load %arg8[%c0_31, %c0_32] : memref<96x512xf32, #tpu.memory_space<vmem>>, vector<96x128xf32>
      tpu.vector_store %arg8[%c0_31, %c0_32], %71 {strides = array<i32>} : memref<96x512xf32, #tpu.memory_space<vmem>>, vector<96x128xf32>,
    } else {
    }
    %c0_i32_11 = arith.constant 0 : i32
    %12 = arith.cmpi eq, %arg1, %c0_i32_11 : i32
    %13 = arith.extui %12 : i1 to i32
    %c0_i32_12 = arith.constant 0 : i32
    %14 = arith.cmpi ne, %13, %c0_i32_12 : i32
    scf.if %14 {
      %cst_27 = arith.constant 0.000000e+00 : f32
      %69 = vector.broadcast %cst_27 : f32 to vector<96x128xf32>
      %c0_28 = arith.constant 0 : index
      %c0_29 = arith.constant 0 : index
      %70 = vector.load %arg8[%c0_28, %c0_29] : memref<96x512xf32, #tpu.memory_space<vmem>>, vector<96x128xf32>
      tpu.vector_store %arg8[%c0_28, %c0_29], %69 {strides = array<i32>} : memref<96x512xf32, #tpu.memory_space<vmem>>, vector<96x128xf32>,
    } else {
    }
    %c1_i32 = arith.constant 1 : i32
    %15 = arith.addi %arg1, %c1_i32 : i32
    %c256_i32 = arith.constant 256 : i32
    %16 = arith.muli %15, %c256_i32 : i32
    %c128_i32 = arith.constant 128 : i32
    %17 = arith.addi %16, %c128_i32 : i32
    %c256_i32_13 = arith.constant 256 : i32
    %18 = arith.cmpi sgt, %17, %c256_i32_13 : i32
    %19 = arith.extui %18 : i1 to i32
    %c0_i32_14 = arith.constant 0 : i32
    %20 = arith.cmpi ne, %19, %c0_i32_14 : i32
    scf.if %20 {
      %c256_i32_27 = arith.constant 256 : i32
      %69 = arith.muli %arg1, %c256_i32_27 : i32
      %c128_i32_28 = arith.constant 128 : i32
      %70 = arith.subi %69, %c128_i32_28 : i32
      %71 = tpu.iota {dimensions = array<i32: 1>} : vector<1x512xi32>
      %72 = vector.broadcast %70 : i32 to vector<1x512xi32>
      %73 = arith.addi %72, %71 : vector<1x512xi32>
      %c256_i32_29 = arith.constant 256 : i32
      %74 = vector.broadcast %c256_i32_29 : i32 to vector<1x512xi32>
      %75 = arith.cmpi slt, %73, %74 : vector<1x512xi32>
      %c0_30 = arith.constant 0 : index
      %c0_31 = arith.constant 0 : index
      %76 = vector.load %arg8[%c0_30, %c0_31] : memref<96x512xf32, #tpu.memory_space<vmem>>, vector<96x512xf32>
      %cst_32 = arith.constant 0.000000e+00 : f32
      %77 = vector.shape_cast %75 : vector<1x512xi1> to vector<1x512xi1>
      %78 = vector.broadcast %77 : vector<1x512xi1> to vector<96x512xi1>
      %79 = vector.broadcast %cst_32 : f32 to vector<96x512xf32>
      %80 = arith.select %78, %76, %79 : vector<96x512xi1>, vector<96x512xf32>
      %c0_33 = arith.constant 0 : index
      %c0_34 = arith.constant 0 : index
      %81 = vector.load %arg8[%c0_33, %c0_34] : memref<96x512xf32, #tpu.memory_space<vmem>>, vector<96x512xf32>
      tpu.vector_store %arg8[%c0_33, %c0_34], %80 {strides = array<i32>} : memref<96x512xf32, #tpu.memory_space<vmem>>, vector<96x512xf32>,
    } else {
    }
    %c0_15 = arith.constant 0 : index
    %c128_16 = arith.constant 128 : index
    %21 = vector.load %arg8[%c0_15, %c128_16] : memref<96x512xf32, #tpu.memory_space<vmem>>, vector<32x256xf32>
    %c32 = arith.constant 32 : index
    %c0_17 = arith.constant 0 : index
    %22 = vector.load %arg8[%c32, %c0_17] : memref<96x512xf32, #tpu.memory_space<vmem>>, vector<32x512xf32>
    %c385_i32 = arith.constant 385 : i32
    %23 = tpu.dynamic_rotate %22 by %c385_i32 dim 1 : vector<32x512xf32>, i32 -> vector<32x512xf32>
    %24 = vector.extract_strided_slice %23 {offsets = [0, 0], sizes = [32, 256], strides = [1, 1]} : vector<32x512xf32> to vector<32x256xf32>
    %25 = arith.mulf %21, %24 : vector<32x256xf32>
    %c384_i32 = arith.constant 384 : i32
    %26 = tpu.dynamic_rotate %22 by %c384_i32 dim 1 : vector<32x512xf32>, i32 -> vector<32x512xf32>
    %27 = vector.extract_strided_slice %26 {offsets = [0, 0], sizes = [32, 256], strides = [1, 1]} : vector<32x512xf32> to vector<32x256xf32>
    %28 = arith.mulf %21, %27 : vector<32x256xf32>
    %c383_i32 = arith.constant 383 : i32
    %29 = tpu.dynamic_rotate %22 by %c383_i32 dim 1 : vector<32x512xf32>, i32 -> vector<32x512xf32>
    %30 = vector.extract_strided_slice %29 {offsets = [0, 0], sizes = [32, 256], strides = [1, 1]} : vector<32x512xf32> to vector<32x256xf32>
    %31 = arith.mulf %21, %30 : vector<32x256xf32>
    %32 = arith.maximumf %25, %28 : vector<32x256xf32>
    %33 = arith.maximumf %32, %31 : vector<32x256xf32>
    %c64 = arith.constant 64 : index
    %c0_18 = arith.constant 0 : index
    %34 = vector.load %arg8[%c64, %c0_18] : memref<96x512xf32, #tpu.memory_space<vmem>>, vector<32x512xf32>
    %c0_19 = arith.constant 0 : index
    %c0_20 = arith.constant 0 : index
    %35 = vector.load %arg6[%c0_19, %c0_20] : memref<32x3xf32, #tpu.memory_space<vmem>>, vector<32x3xf32>
    %36 = arith.subf %25, %33 : vector<32x256xf32>
    %37 = math.exp %36 : vector<32x256xf32>
    %c385_i32_21 = arith.constant 385 : i32
    %38 = tpu.dynamic_rotate %34 by %c385_i32_21 dim 1 : vector<32x512xf32>, i32 -> vector<32x512xf32>
    %39 = vector.extract_strided_slice %38 {offsets = [0, 0], sizes = [32, 256], strides = [1, 1]} : vector<32x512xf32> to vector<32x256xf32>
    %40 = vector.extract_strided_slice %35 {offsets = [0, 0], sizes = [32, 1], strides = [1, 1]} : vector<32x3xf32> to vector<32x1xf32>
    %41 = vector.broadcast %40 : vector<32x1xf32> to vector<32x256xf32>
    %42 = arith.addf %39, %41 : vector<32x256xf32>
    %43 = arith.mulf %37, %42 : vector<32x256xf32>
    %44 = arith.subf %28, %33 : vector<32x256xf32>
    %45 = math.exp %44 : vector<32x256xf32>
    %46 = arith.addf %37, %45 : vector<32x256xf32>
    %c384_i32_22 = arith.constant 384 : i32
    %47 = tpu.dynamic_rotate %34 by %c384_i32_22 dim 1 : vector<32x512xf32>, i32 -> vector<32x512xf32>
    %48 = vector.extract_strided_slice %47 {offsets = [0, 0], sizes = [32, 256], strides = [1, 1]} : vector<32x512xf32> to vector<32x256xf32>
    %49 = vector.extract_strided_slice %35 {offsets = [0, 1], sizes = [32, 1], strides = [1, 1]} : vector<32x3xf32> to vector<32x1xf32>
    %50 = vector.broadcast %49 : vector<32x1xf32> to vector<32x256xf32>
    %51 = arith.addf %48, %50 : vector<32x256xf32>
    %52 = arith.mulf %45, %51 : vector<32x256xf32>
    %53 = arith.addf %43, %52 : vector<32x256xf32>
    %54 = arith.subf %31, %33 : vector<32x256xf32>
    %55 = math.exp %54 : vector<32x256xf32>
    %56 = arith.addf %46, %55 : vector<32x256xf32>
    %c383_i32_23 = arith.constant 383 : i32
    %57 = tpu.dynamic_rotate %34 by %c383_i32_23 dim 1 : vector<32x512xf32>, i32 -> vector<32x512xf32>
    %58 = vector.extract_strided_slice %57 {offsets = [0, 0], sizes = [32, 256], strides = [1, 1]} : vector<32x512xf32> to vector<32x256xf32>
    %59 = vector.extract_strided_slice %35 {offsets = [0, 2], sizes = [32, 1], strides = [1, 1]} : vector<32x3xf32> to vector<32x1xf32>
    %60 = vector.broadcast %59 : vector<32x1xf32> to vector<32x256xf32>
    %61 = arith.addf %58, %60 : vector<32x256xf32>
    %62 = arith.mulf %55, %61 : vector<32x256xf32>
    %63 = arith.addf %53, %62 : vector<32x256xf32>
    %64 = tpu.reciprocal %56 {approx = true} : vector<32x256xf32> -> vector<32x256xf32>
    %65 = arith.mulf %63, %64 : vector<32x256xf32>
    %c0_24 = arith.constant 0 : index
    %c0_25 = arith.constant 0 : index
    %c0_26 = arith.constant 0 : index
    %66 = vector.load %arg7[%c0_24, %c0_25, %c0_26] : memref<1x32x256xf32, #tpu.memory_space<vmem>>, vector<1x32x256xf32>
    %67 = vector.shape_cast %66 : vector<1x32x256xf32> to vector<32x256xf32>
    %68 = vector.shape_cast %65 : vector<32x256xf32> to vector<1x32x256xf32>
    tpu.vector_store %arg7[%c0_24, %c0_25, %c0_26], %68 {strides = array<i32>} : memref<1x32x256xf32, #tpu.memory_space<vmem>>, vector<1x32x256xf32>,
    return
  }
  func.func @transform_0(%arg0: i32, %arg1: i32) -> (i32, i32, i32) {
    %c2_i32 = arith.constant 2 : i32
    %0 = arith.muli %arg1, %c2_i32 : i32
    %c1_i32 = arith.constant 1 : i32
    %1 = arith.subi %0, %c1_i32 : i32
    %c0_i32 = arith.constant 0 : i32
    %2 = arith.maxsi %1, %c0_i32 : i32
    %c0_i32_0 = arith.constant 0 : i32
    %c0_i32_1 = arith.constant 0 : i32
    return %arg0, %c0_i32_0, %2 : i32, i32, i32
  }
  func.func @transform_1(%arg0: i32, %arg1: i32) -> (i32, i32, i32) {
    %c0_i32 = arith.constant 0 : i32
    %c0_i32_0 = arith.constant 0 : i32
    return %arg0, %c0_i32, %arg1 : i32, i32, i32
  }
  func.func @transform_2(%arg0: i32, %arg1: i32) -> (i32, i32, i32) {
    %c1_i32 = arith.constant 1 : i32
    %0 = arith.addi %arg1, %c1_i32 : i32
    %c2_i32 = arith.constant 2 : i32
    %1 = arith.muli %0, %c2_i32 : i32
    %c1_i32_0 = arith.constant 1 : i32
    %2 = arith.minsi %1, %c1_i32_0 : i32
    %c0_i32 = arith.constant 0 : i32
    %c0_i32_1 = arith.constant 0 : i32
    return %arg0, %c0_i32, %2 : i32, i32, i32
  }
  func.func @transform_3(%arg0: i32, %arg1: i32) -> (i32, i32) {
    %c0_i32 = arith.constant 0 : i32
    %c0_i32_0 = arith.constant 0 : i32
    %c0_i32_1 = arith.constant 0 : i32
    return %c0_i32, %c0_i32_0 : i32, i32
  }
  func.func @transform_4(%arg0: i32, %arg1: i32) -> (i32, i32) {
    %c0_i32 = arith.constant 0 : i32
    %c0_i32_0 = arith.constant 0 : i32
    %c0_i32_1 = arith.constant 0 : i32
    return %c0_i32, %c0_i32_0 : i32, i32
  }
  func.func @transform_5(%arg0: i32, %arg1: i32) -> (i32, i32, i32) {
    %c0_i32 = arith.constant 0 : i32
    %c0_i32_0 = arith.constant 0 : i32
    return %arg0, %c0_i32, %arg1 : i32, i32, i32
  }
}

</mosaic_0001>

<bundles_post_ra>
// kernel: tpu_custom_call.1
= control target key start
LH: loop header
LB: loop body
LE: loop exit
PB: predicated region body
PF: predicated region fallthrough
CT: control target
= control target key end

     0   :  { %10 = vsyncpa [#allocation5], 0  ;;  %s2775_s0 = inlined_call_operand.vmem [shape: f32[2,16,256], index: 0, kind: input, shape index: {}]   ;;  %s2776_s1 = inlined_call_operand.vmem [shape: f32[2,16,256], index: 1, kind: input, shape index: {}]   ;;  %s2777_s2 = inlined_call_operand.hbm [shape: f32[2,16,256], index: 2, kind: input, shape index: {}]   ;;  %s2778_s3 = inlined_call_operand.vmem [shape: f32[96,16], index: 3, kind: input, shape index: {}]   ;;  %s2779_s4 = inlined_call_operand.vmem [shape: f32[32,3], index: 4, kind: input, shape index: {}]   ;;  %s2780_s5 = inlined_call_operand.hbm [shape: f32[2,32,256], index: 5, kind: output, shape index: {}]  }
   0x1   :  { %12 = vsyncpa [#allocation5 + $0x1], 0 }
   0x2   :  { %13 = vsyncpa [#allocation6], 0 }
   0x3   :  { %15 = vsyncpa [#allocation6 + $0x1], 0  ;;  %s2104_s0 = smov 0   ;;  %s2106_s18 = smov 0  }
   0x4   :  { %s2108_s19 = smov 0   ;;  %s2110_s20 = smov 0  }
   0x5   :  { %s2112_s21 = smov 0   ;;  %s2114_s22 = smov 0  }
   0x6 LB: > { %s1662_s23 = sadd.s32 4294967295, %s2059_s22   ;;  %s1663_s24 = sadd.s32 4294967294, %s2059_s22   ;;  %s2059_s22 = sphi %s2114_s22, %s21_s22   ;;  %s2055_s21 = sphi %s2112_s21, %s2802_s21   ;;  %s2051_s20 = sphi %s2110_s20, %s2801_s20   ;;  %s2047_s19 = sphi %s2108_s19, %s2800_s19   ;;  %s2043_s18 = sphi %s2106_s18, %s2799_s18   ;;  %s2039_s0 = sphi %s2104_s0, %s2798_s0  }
   0x7   : > { %s33_s25 = sadd.s32 1, %s2055_s21  ;;  %s50_s26 = sadd.s32 1, %s2047_s19 }
   0x8   : > { %p35_p0 = scmp.ge.s32.totalorder %s33_s25, 2  ;;  %p57_p1 = scmp.ne.s32.totalorder %s2047_s19, %s2043_s18 }
   0x9   : > { %p58_p2 = scmp.eq.s32.totalorder %s2059_s22, 0  ;;  %p127_p3 = scmp.ne.s32.totalorder %s2043_s18, %s2039_s0 }
   0xa   : > { %s2804_s25 = smov (%p35_p0, %s33_s25), 0  ;;  %p128_p5 = scmp.eq.s32.totalorder %s1662_s23, 0 }
   0xb   : > { %p2145_p4 = por %p58_p2, %p57_p1  ;;  %s45_s28 = ssub.s32 %s2055_s21, %s2804_s25 }
   0xc   : > { %p195_p6 = scmp.eq.s32.totalorder %s1662_s23, 1  ;;  %p48_p7 = scmp.eq.s32.totalorder %s45_s28, 0 }
   0xd   : > { %p2151_p8 = por %p128_p5, %p127_p3  ;;  %p201_p10 = scmp.eq.s32.totalorder %s1663_s24, 1 }
   0xe   : > { %p2155_p9 = por %p195_p6, %p57_p1  ;;  %p2781_p12 = scmp.ge.s32.totalorder %s2059_s22, 2 }
   0xf   : > { %s2160_s6 = scalar_select %p48_p7, %s2047_s19, %s50_s26  }
  0x10   : > { %s2787_s30 = scalar_select %p2155_p9, 1, 0 }
  0x11   : > { %p2162_p11 = por %p201_p10, %p127_p3  ;;  %223 = sbr.rel (%p2781_p12) target bundleno = 47 (0x2f), region = 24 }
  0x12   : > { %s291_s8 = sand.u32 (!%p2781_p12), 1, %s2047_s19   ;;  %s1724_s9 = sshll.u32 (!%p2781_p12), %s2055_s21, 9 }
  0x13   : > { %s2788_s7 = scalar_select %p2162_p11, 1, 0 }
  0x14   : > { %s1669_s10 = sshll.u32 (!%p2781_p12), %s291_s8, 4  ;;  %s1721_s11 = sadd.s32 (!%p2781_p12), 128, %s1724_s9 }
  0x15   : > { %s2174_s14 = scalar_lea.hbm (!%p2781_p12), %s2777_s2, %s1721_s11  ;;  %s295_s15 = scalar_lea.vmem (!%p2781_p12), [#allocation4], %s1669_s10 }
  0x16   : > { %s307_s16 = sshll.u32 (!%p2781_p12), %s295_s15, 4  ;;  %s2178_s17 = scalar_lea.sflag (!%p2781_p12), [#allocation5], %s291_s8  ;;  %s2176_s16 = int_to_ptr.vmem [resolvable:$true] %s307_s16 }
  0x17   : > { %s1949_s23 = scalar_lea.hbm (!%p2781_p12), %s2174_s14, 256  ;;  %s1953_s28 = scalar_lea.hbm (!%p2781_p12), %s2777_s2, 1024 }
  0x18   : > { %p1950_p13 = scmp.ne.s32.totalorder %s2174_s14, %s1949_s23  ;;  %p1954_p2 = scmp.lt.u32.totalorder %s2174_s14, %s2777_s2 }
  0x19   : > { %p1955_p3 = scmp.lt.u32.totalorder %s1953_s28, %s1949_s23  ;;  %p1957_p6 = scmp.lt.u32.totalorder %s1949_s23, %s2174_s14 }
  0x1a   : > { %p1951_p0 = pnand %p1950_p13, %p2145_p4 }
  0x1b   : > { %p1956_p5 = por %p1955_p3, %p1954_p2 }
  0x1c   : > { %p1952_p1 = pneg %p1951_p0 }
  0x1d   : > { %p1958_p7 = por %p1957_p6, %p1956_p5 }
  0x1f   : > { %p1959_p10 = pnand %p1958_p7, %p1952_p1 }
  0x21   : > { %1962 = shalt.err (!%p1959_p10)
}
  0x22   : > { %s1963_s8 = scalar_lea.vmem %s2176_s16, 256  ;;  %s2061_s10 = smov [#allocation4]  }
  0x23   : > { %p1964_p13 = scmp.ne.s32.totalorder %s2176_s16, %s1963_s8  ;;  %s1967_s12 = sshll.u32 %s2061_s10, 4  ;;  %s1968_s12 = int_to_ptr.vmem [resolvable:$false] %s1967_s12 }
  0x24   : > { %s1969_s13 = scalar_lea.vmem %s1968_s12, 512  ;;  %p1970_p11 = scmp.lt.s32.totalorder %s2176_s16, %s1968_s12 }
  0x25   : > { %p1965_p0 = pnand %p1964_p13, %p2145_p4  ;;  %p1971_p9 = scmp.lt.s32.totalorder %s1969_s13, %s1963_s8 }
  0x27   : > { %p1966_p12 = pneg %p1965_p0  ;;  %p1972_p2 = por %p1971_p9, %p1970_p11 }
  0x29   : > { %p1973_p3 = pnand %p1972_p2, %p1966_p12 }
  0x2b   : > { %1976 = shalt.err (!%p1973_p3)
}
  0x2c   : > { %s2062_s15 = smov 256   ;;  %s2063_s23 = smov 128  }
  0x2d   : > { %s2064_s24 = smov 8  }
  0x2e   : > { %1771 = dma.hbm_to_vmem [thread:$0]  (%p2145_p4), %s2174_s14, 256, %s2176_s16, %s2178_s17, %s2062_s15, %s2063_s23, %s2064_s24  }
  0x2f PF: > { %p1672_p1 = scmp.ge.s32.totalorder %s2059_s22, 1  ;;  %p315_p5 = scmp.lt.s32.totalorder %s2059_s22, 3 }
  0x31   : > { %p316_p6 = pnand %p1672_p1, %p315_p5 }
  0x33   : > { %319 = sbr.rel (%p316_p6) target bundleno = 518 (0x206), region = 74 }
  0x3a   : > { %s2205_s26 = sand.u32 1, %s2043_s18  }
  0x3b   : > { %s1674_s28 = sshll.u32 %s2205_s26, 4  ;;  %s329_s9 = scalar_lea.sflag [#allocation5], %s2205_s26 }
  0x3c   : > { %s2209_s11 = scalar_lea.vmem [#allocation4], %s1674_s28 }
  0x3d   : > { %2030 = dma.done.wait (%p2151_p8), %s329_s9, 256  }
  0x3e   : > { %2032 = vsyncadd (%p2151_p8), %s329_s9, 4294967040  ;;  %p377_p4 = scmp.lt.s32.totalorder %s2051_s20, 1  ;;  %v2065_v0 = vmov 0.0   ;;  %v2066_v1 = vmov 0   ;;  %s2067_s14 = smov 1   ;;  %v391_v8 = vld [vmem:[%s2778_s3] sm:$0xff] }
  0x3f   : > { %508 = vmatprep.mubr.f32.mxu0 %v2065_v0  ;;  %562 = vmatprep.mubr.f32.mxu1 %v2065_v0  ;;  %s2068_s16 = smov 127   ;;  %vm407_vm0 = vcmask 130048   ;;  %v2236_v9 = vld [vmem:[%s2778_s3 + $0x48] sm:$0xff]  ;;  %v605_v11 = vld [vmem:[%s2209_s11] sm:$0xff]  ;;  %v402_v19 = vld [vmem:[%s2778_s3 + $0x58] sm:$0xff]  ;;  %v2069_v21 = vmov 1  }
  0x40   : > { %s378_s27 = scalar_select %p377_p4, %s2051_s20, 1  ;;  %1870 = vset.pattern.permute.xlu1 %v2066_v1  ;;  %1869 = vset.pattern.permute.xlu0 %v2066_v1  ;;  %v1227_v10 = vld [vmem:[%s2779_s4 + $0x8] sm:$0xff]  ;;  %v2250_v12 = vld [vmem:[%s2779_s4 + $0x10] sm:$0xff]  ;;  %v1226_v17 = vld [vmem:[%s2779_s4] sm:$0xff]  ;;  %v2070_v25 = vmov 2  }
  0x41   : > { %1840 = vrot.lane.b32.xlu0 %v2065_v0, %s2067_s14  ;;  %1855 = vrot.lane.b32.xlu1 %v2065_v0, %s2068_s16  ;;  %v606_v13 = vld [vmem:[%s2209_s11 + $0x8] sm:$0xff]  ;;  %v401_v15 = vld [vmem:[%s2778_s3 + $0x50] sm:$0xff]  ;;  %s1723_s9 = sshll.u32 %s2051_s20, 10  ;;  %s1523_s20 = scalar_lea.sflag [#allocation6], %s2205_s26 }
  0x42   : > { %s1722_s29 = sshll.u32 %s378_s27, 5  ;;  %v392_v14 = vld [vmem:[%s2778_s3 + $0x8] sm:$0xff]  ;;  %v1765_v16 = vpack.c.bf16 %v606_v13, %v605_v11  ;;  %v393_v18 = vld [vmem:[%s2778_s3 + $0x10] sm:$0xff]  ;;  %v2280_v20 = vld [vmem:[%s2779_s4 + $0x18] sm:$0xff]  ;;  %s2720_s8 = scalar_lea.hbm %s2780_s5, %s1723_s9 }
  0x43   : > { %s384_s10 = scalar_lea.vmem %s2776_s1, %s1722_s29  ;;  %v394_v22 = vld [vmem:[%s2778_s3 + $0x18] sm:$0xff]  ;;  %v395_v23 = vld [vmem:[%s2778_s3 + $0x20] sm:$0xff]  ;;  %v396_v24 = vld [vmem:[%s2778_s3 + $0x28] sm:$0xff]  ;;  %p2795_p9 = scmp.ne.s32.totalorder %s2787_s30, 0 }
  0x44   : > { %v404_v2 = vld [vmem:[%s384_s10 + $0x8] sm:$0xff]  ;;  %v406_v3 = vld [vmem:[%s384_s10 + $0x18] sm:$0xff]  ;;  %v403_v4 = vld [vmem:[%s384_s10] sm:$0xff]  ;;  %s2071_s12 = smov [#allocation7]  }
  0x45   : > { %1845 = vrot.lane.b32.xlu0 %v2065_v0, %s2067_s14  ;;  %v1761_v5 = vpack.c.bf16 %v406_v3, %v404_v2  ;;  %v405_v6 = vld [vmem:[%s384_s10 + $0x10] sm:$0xff]  ;;  %1865 = vrot.lane.b32.xlu1 %v2065_v0, %s2067_s14  ;;  %v398_v27 = vld [vmem:[%s2778_s3 + $0x38] sm:$0xff]  ;;  %s1981_s13 = sshll.u32 %s2071_s12, 4  ;;  %s1982_s13 = int_to_ptr.vmem [resolvable:$false] %s1981_s13 }
  0x46   : > { %v1763_v7 = vpack.c.bf16 %v405_v6, %v403_v4  ;;  %v397_v26 = vld [vmem:[%s2778_s3 + $0x30] sm:$0xff]  ;;  %v399_v28 = vld [vmem:[%s2778_s3 + $0x40] sm:$0xff]  ;;  %s1983_s11 = scalar_lea.vmem %s1982_s13, 2048 }
  0x47   : > { %1762 = vmatprep.subr.bf16.mxu0 %v1761_v5  ;;  %1769 = vmatprep.subr.bf16.mxu1 %v1761_v5 }
  0x48   : > { %1764 = vmatpush1.bf16.msra.mxu0 %v1763_v7  ;;  %1770 = vmatpush1.bf16.msra.mxu1 %v1763_v7 }
  0x49   : > { %1850 = vrot.lane.b32.xlu0 %v2065_v0, %s2068_s16  ;;  %1293 = vperm.xlu1 %1870, %v1227_v10  }
  0x4a   : > { %1766 = vmatprep.subr.bf16.mxu1 %v1765_v16 }
  0x4b   : > { %1678 = vmatmul.mubr.msk.f32.vlgmr.msra.gmra.mrb[0].mxu0 %vm407_vm0, %v391_v8  ;;  %1687 = vmatmul.mubr.msk.f32.vlgmr.msra.gmra.mrb[0].mxu1 %vm407_vm0, %v2236_v9 }
  0x4c   : > { %514 = vmatprep.mubr.f32.mxu0 %v2065_v0  ;;  %568 = vmatprep.mubr.f32.mxu1 %v2065_v0 }
  0x4d   : > { %1860 = vrot.lane.b32.xlu0 %v2065_v0, %s2067_s14  ;;  %1298 = vperm.xlu1 %1870, %v2250_v12  }
  0x4e   : > { %1768 = vmatpush3.bf16.msra.mxu1 %v1765_v16 }
  0x4f   : > { %1679 = vmatmul.mubr.msk.f32.gmra.mrb[2].mxu0 %vm407_vm0, %v392_v14  ;;  %1688 = vmatmul.mubr.msk.f32.gmra.mrb[2].mxu1 %vm407_vm0, %v401_v15 }
  0x50   : > { %520 = vmatprep.mubr.f32.mxu0 %v2065_v0  ;;  %574 = vmatprep.mubr.f32.mxu1 %v2065_v0 }
  0x51   : > { %1288 = vperm.xlu0 %1869, %v1226_v17   ;;  %1871 = vset.pattern.permute.xlu1 %v2069_v21 }
  0x52   : > { %1355 = vperm.xlu1 %1871, %v1226_v17  }
  0x53   : > { %1680 = vmatmul.mubr.msk.f32.gmra.mrb[4].mxu0 %vm407_vm0, %v393_v18  ;;  %1689 = vmatmul.mubr.msk.f32.gmra.mrb[4].mxu1 %vm407_vm0, %v402_v19 }
  0x54   : > { %526 = vmatprep.mubr.f32.mxu0 %v2065_v0  ;;  %1743 = vmatprep.mubr.msk.f32.mxu1 %vm407_vm0, %v391_v8 }
  0x55   : > { %1303 = vperm.xlu0 %1869, %v2280_v20  }
  0x56   : > { %1363 = vperm.xlu1 %1871, %v2250_v12  }
  0x57   : > { %1681 = vmatmul.mubr.msk.f32.gmra.mrb[6].mxu0 %vm407_vm0, %v394_v22  ;;  %1744 = vmatmul.mubr.msk.f32.vlgmr.msra.gmra.mrb[6].mxu1 %vm407_vm0, %v392_v14 }
  0x58   : > { %532 = vmatprep.mubr.f32.mxu0 %v2065_v0  ;;  %1746 = vmatprep.mubr.msk.f32.mxu1 %vm407_vm0, %v393_v18 }
  0x59   : > { %1872 = vset.pattern.permute.xlu0 %v2069_v21 }
  0x5a   : > { %1359 = vperm.xlu0 %1872, %v1227_v10   ;;  %1367 = vperm.xlu1 %1871, %v2280_v20  }
  0x5b   : > { %1682 = vmatmul.mubr.msk.f32.gmra.mrb[8].mxu0 %vm407_vm0, %v395_v23  ;;  %1747 = vmatmul.mubr.msk.f32.gmra.mrb[8].mxu1 %vm407_vm0, %v394_v22 }
  0x5c   : > { %538 = vmatprep.mubr.f32.mxu0 %v2065_v0  ;;  %1749 = vmatprep.mubr.msk.f32.mxu1 %vm407_vm0, %v395_v23 }
  0x5e   : > { %1873 = vset.pattern.permute.xlu0 %v2070_v25  ;;  %1874 = vset.pattern.permute.xlu1 %v2070_v25 }
  0x5f   : > { %1683 = vmatmul.mubr.msk.f32.gmra.mrb[10].mxu0 %vm407_vm0, %v396_v24  ;;  %1459 = vperm.xlu0 %1873, %v1226_v17  }
  0x60   : > { %544 = vmatprep.mubr.f32.mxu0 %v2065_v0  ;;  %1463 = vperm.xlu1 %1874, %v1227_v10  }
  0x61   : > { %1750 = vmatmul.mubr.msk.f32.gmra.mrb[10].mxu1 %vm407_vm0, %v396_v24 }
  0x62   : > { %1752 = vmatprep.mubr.msk.f32.mxu1 %vm407_vm0, %v397_v26 }
  0x63   : > { %1684 = vmatmul.mubr.msk.f32.gmra.mrb[12].mxu0 %vm407_vm0, %v397_v26 }
  0x64   : > { %550 = vmatprep.mubr.f32.mxu0 %v2065_v0 }
  0x65   : > { %1753 = vmatmul.mubr.msk.f32.gmra.mrb[12].mxu1 %vm407_vm0, %v398_v27 }
  0x66   : > { %1755 = vmatprep.mubr.msk.f32.mxu1 %vm407_vm0, %v399_v28 }
  0x67   : > { %1685 = vmatmul.mubr.msk.f32.gmra.mrb[14].mxu0 %vm407_vm0, %v398_v27 }
  0x68   : > { %556 = vmatprep.mubr.f32.mxu0 %v2065_v0 }
  0x69   : > { %1756 = vmatmul.mubr.msk.f32.gmra.mrb[14].mxu1 %vm407_vm0, %v2236_v9 }
  0x6a   : > { %1758 = vmatprep.mubr.msk.f32.mxu1 %vm407_vm0, %v401_v15 }
  0x6b   : > { %1686 = vmatmul.mubr.msk.f32.gmra.mrb[16].mxu0 %vm407_vm0, %v399_v28 }
  0x6d   : > { %1759 = vmatmul.mubr.msk.f32.gmra.mrb[16].mxu1 %vm407_vm0, %v402_v19 }
  0xb3   : > { %v2330_v29 = vpop.permute.xlu0 %1840  ;;  %v2334_v31 = vpop.permute.xlu1 %1855 }
  0xb7   : > { %v2332_v30 = vpop.permute.xlu0 %1845  ;;  %v2338_v33 = vpop.permute.xlu1 %1865 }
  0xbb   : > { %v2336_v32 = vpop.permute.xlu0 %1850 }
  0xbf   : > { %v2340_v34 = vpop.permute.xlu0 %1860 }
  0xc8   : > { %v2342_v35 = vpop.permute.xlu1 %1293 }
  0xcc   : > { %v2346_v37 = vpop.permute.xlu1 %1298 }
  0xd0   : > { %v2344_v36 = vpop.permute.xlu0 %1288 }
  0xd1   : > { %2789 = vst [vmem:[#allocation10_spill] sm:$0xff] %v2344_v36  ;;  %v2350_v39 = vpop.permute.xlu1 %1355 }
  0xd4   : > { %v2348_v38 = vpop.permute.xlu0 %1303 }
  0xd5   : > { %v2354_v41 = vpop.permute.xlu1 %1363 }
  0xd9   : > { %v2352_v40 = vpop.permute.xlu0 %1359  ;;  %v1368_v51 = vpop.permute.xlu1 %1367 }
 0x11e   : > { %v2356_v42 = vpop.f32.mrb[0].mxu0  ;;  %v2358_v43 = vpop.f32.mrb[0].mxu1 }
 0x11f   : > { %1264 = vrot.lane.b32.xlu1 %v2358_v43, %s2067_s14  ;;  %v2362_v44 = vpop.f32.mrb[1].mxu0  ;;  %v2364_v45 = vpop.f32.mrb[1].mxu1 }
 0x120   : > { %v2368_v46 = vadd.f32 %v2352_v40, %v2364_v45 }
 0x122   : > { %v2370_v47 = vpop.f32.mrb[2].mxu0  ;;  %v2372_v48 = vpop.f32.mrb[2].mxu1 }
 0x123   : > { %1272 = vrot.lane.b32.xlu1 %v2364_v45, %s2067_s14  ;;  %1266 = vrot.lane.b32.xlu0 %v2372_v48, %s2067_s14  ;;  %v2378_v49 = vpop.f32.mrb[3].mxu0  ;;  %v2380_v50 = vpop.f32.mrb[3].mxu1 }
 0x126   : > { %v2382_v52 = vpop.f32.mrb[4].mxu0  ;;  %v576_v53 = vpop.f32.mrb[4].mxu1 }
 0x127   : > { %1268 = vrot.lane.b32.xlu1 %v576_v53, %s2067_s14  ;;  %v2385_v54 = vpop.f32.mrb[5].mxu0  ;;  %v2387_v55 = vadd.f32 %v1368_v51, %v576_v53  ;;  %v578_v56 = vpop.f32.mrb[5].mxu1 }
 0x128   : > { %v2389_v57 = vadd.f32 %v1368_v51, %v578_v56 }
 0x12a   : > { %2790 = vst [vmem:[#allocation11_spill] sm:$0xff] %v2389_v57  ;;  %v2391_v58 = vpop.f32.mrb[6].mxu0  ;;  %v1745_v59 = vpop.f32.mrb[6].mxu1 }
 0x12b   : > { %v2393_v60 = vpop.f32.mrb[7].mxu0  ;;  %v673_v61 = vpop.f32.mrb[7].mxu1 }
 0x12c   : > { %v2478_v59 = vpop.permute.xlu0 %1459 }
 0x12d   : > { %2791 = vst [vmem:[#allocation12_spill] sm:$0xff] %v2478_v59 }
 0x12e   : > { %v534_v62 = vpop.f32.mrb[8].mxu0  ;;  %v1748_v63 = vpop.f32.mrb[8].mxu1 }
 0x12f   : > { %v2396_v1 = vmul.f32 %v534_v62, %v2356_v42  ;;  %1153 = vrot.lane.b32.xlu0 %v534_v62, %s2068_s16  ;;  %1110 = vrot.lane.b32.xlu1 %v534_v62, %s2067_s14  ;;  %v536_v2 = vpop.f32.mrb[9].mxu0  ;;  %v683_v3 = vpop.f32.mrb[9].mxu1  ;;  %v1842_v62 = vunpack.i.l.bf16 %v2330_v29 }
 0x130   : > { %v2401_v4 = vmul.f32 %v536_v2, %v2362_v44 }
 0x132   : > { %v540_v5 = vpop.f32.mrb[10].mxu0 }
 0x133   : > { %v2404_v6 = vmul.f32 %v540_v5, %v2370_v47  ;;  %1118 = vrot.lane.b32.xlu0 %v536_v2, %s2067_s14  ;;  %1112 = vrot.lane.b32.xlu1 %v540_v5, %s2067_s14  ;;  %v542_v7 = vpop.f32.mrb[11].mxu0 }
 0x134   : > { %v2409_v8 = vmul.f32 %v542_v7, %v2378_v49  ;;  %v1751_v9 = vpop.f32.mrb[10].mxu1 }
 0x135   : > { %v693_v10 = vpop.f32.mrb[11].mxu1 }
 0x136   : > { %v546_v11 = vpop.f32.mrb[12].mxu0 }
 0x137   : > { %v2412_v13 = vmul.f32 %v546_v11, %v2382_v52  ;;  %1161 = vrot.lane.b32.xlu0 %v536_v2, %s2068_s16  ;;  %1155 = vrot.lane.b32.xlu1 %v540_v5, %s2068_s16  ;;  %v548_v14 = vpop.f32.mrb[13].mxu0 }
 0x138   : > { %v2417_v15 = vmul.f32 %v548_v14, %v2385_v54  ;;  %v1754_v16 = vpop.f32.mrb[12].mxu1 }
 0x139   : > { %v703_v17 = vpop.f32.mrb[13].mxu1 }
 0x13a   : > { %v552_v18 = vpop.f32.mrb[14].mxu0 }
 0x13b   : > { %v2420_v19 = vmul.f32 %v552_v18, %v2391_v58  ;;  %1120 = vrot.lane.b32.xlu1 %v542_v7, %s2067_s14  ;;  %1114 = vrot.lane.b32.xlu0 %v546_v11, %s2067_s14  ;;  %v554_v21 = vpop.f32.mrb[15].mxu0 }
 0x13c   : > { %v2425_v22 = vmul.f32 %v554_v21, %v2393_v60  ;;  %v1757_v23 = vpop.f32.mrb[14].mxu1 }
 0x13d   : > { %v713_v24 = vpop.f32.mrb[15].mxu1 }
 0x13e   : > { %v2427_v25 = vpop.f32.mrb[16].mxu0 }
 0x13f   : > { %1163 = vrot.lane.b32.xlu1 %v542_v7, %s2068_s16  ;;  %1157 = vrot.lane.b32.xlu0 %v546_v11, %s2068_s16  ;;  %v2431_v26 = vpop.f32.mrb[17].mxu0  ;;  %v1843_v7 = vunpack.i.h.bf16 %v2330_v29 }
 0x140   : > { %v1760_v27 = vpop.f32.mrb[16].mxu1 }
 0x141   : > { %v723_v28 = vpop.f32.mrb[17].mxu1 }
 0x143   : > { %1122 = vrot.lane.b32.xlu0 %v548_v14, %s2067_s14  ;;  %1116 = vrot.lane.b32.xlu1 %v552_v18, %s2067_s14 }
 0x147   : > { %1165 = vrot.lane.b32.xlu0 %v548_v14, %s2068_s16  ;;  %1159 = vrot.lane.b32.xlu1 %v552_v18, %s2068_s16 }
 0x14b   : > { %1471 = vperm.xlu0 %1873, %v2280_v20   ;;  %1124 = vrot.lane.b32.xlu1 %v554_v21, %s2067_s14  ;;  %v1126_v20 = vlaneseq }
 0x14f   : > { %1276 = vrot.lane.b32.xlu0 %v578_v56, %s2067_s14  ;;  %1167 = vrot.lane.b32.xlu1 %v554_v21, %s2068_s16  ;;  %v1852_v21 = vunpack.i.l.bf16 %v2336_v32 }
 0x153   : > { %1428 = vrot.lane.b32.xlu0 %v2358_v43, %s2068_s16  ;;  %1467 = vperm.xlu1 %1874, %v2250_v12   ;;  %v2466_v12 = vpop.permute.xlu1 %1463 }
 0x157   : > { %1432 = vrot.lane.b32.xlu0 %v576_v53, %s2068_s16  ;;  %1274 = vrot.lane.b32.xlu1 %v2380_v50, %s2067_s14 }
 0x15b   : > { %1436 = vrot.lane.b32.xlu0 %v2364_v45, %s2068_s16  ;;  %1430 = vrot.lane.b32.xlu1 %v2372_v48, %s2068_s16  ;;  %v2468_v45 = vand.u32 127, %v1126_v20 }
 0x15d   : > { %vm1128_vm1 = vcmp.lt.s32.totalorder %v2468_v45, 1  ;;  %vm1177_vm2 = vcmp.lt.s32.totalorder %v2468_v45, 127 }
 0x15f   : > { %1440 = vrot.lane.b32.xlu0 %v578_v56, %s2068_s16  ;;  %1438 = vrot.lane.b32.xlu1 %v2380_v50, %s2068_s16 }
 0x163   : > { %1426 = vrot.lane.b32.xlu1 %v2427_v25, %s2068_s16  ;;  %1262 = vrot.lane.b32.xlu0 %v2427_v25, %s2067_s14 }
 0x167   : > { %1434 = vrot.lane.b32.xlu1 %v2431_v26, %s2068_s16  ;;  %1270 = vrot.lane.b32.xlu0 %v2431_v26, %s2067_s14  ;;  %s1675_s14 = sshll.u32 %s2205_s26, 6 }
 0x16b   : > { %1876 = vrot.lane.b32.xlu1 %v2065_v0, %s2068_s16  ;;  %1881 = vrot.lane.b32.xlu0 %v2065_v0, %s2068_s16  ;;  %s2674_s16 = scalar_lea.vmem [#allocation7], %s1675_s14 }
 0x16c   : > { %s1538_s27 = sshll.u32 %s2674_s16, 4  ;;  %s2722_s27 = int_to_ptr.vmem [resolvable:$true] %s1538_s27 }
 0x16d   : > { %s1977_s10 = scalar_lea.vmem %s2722_s27, 1024  ;;  %p1984_p7 = scmp.lt.s32.totalorder %s2722_s27, %s1982_s13 }
 0x16e   : > { %p1978_p8 = scmp.ne.s32.totalorder %s2722_s27, %s1977_s10  ;;  %p1985_p10 = scmp.lt.s32.totalorder %s1983_s11, %s1977_s10 }
 0x170   : > { %p1979_p11 = pnand %p1978_p8, %p2795_p9  ;;  %p1986_p13 = por %p1985_p10, %p1984_p7 }
 0x172   : > { %p1980_p12 = pneg %p1979_p11 }
 0x174   : > { %p1987_p0 = pnand %p1986_p13, %p1980_p12 }
 0x191   : > { %v2470_v51 = vpop.permute.xlu1 %1264 }
 0x195   : > { %v1273_v53 = vpop.permute.xlu1 %1272  ;;  %v2480_v61 = vpop.permute.xlu0 %1266 }
 0x196   : > { %v2476_v56 = vsel %vm1128_vm1, %v2470_v51, %v1273_v53 }
 0x199   : > { %v2482_v0 = vpop.permute.xlu1 %1268 }
 0x1a1   : > { %v1154_v63 = vpop.permute.xlu0 %1153  ;;  %v1111_v2 = vpop.permute.xlu1 %1110 }
 0x1a2   : > { %v1133_v3 = vsel %vm1128_vm1, %v1842_v62, %v1111_v2 }
 0x1a3   : > { %v1137_v5 = vmul.f32 %v1133_v3, %v2356_v42 }
 0x1a5   : > { %v1194_v9 = vmax.f32 %v1137_v5, %v2396_v1  ;;  %v1119_v10 = vpop.permute.xlu0 %1118  ;;  %v1113_v11 = vpop.permute.xlu1 %1112 }
 0x1a6   : > { %v1129_v14 = vsel %vm1128_vm1, %v1111_v2, %v1119_v10  ;;  %v1134_v16 = vsel %vm1128_vm1, %v1843_v7, %v1113_v11  ;;  %v1847_v2 = vunpack.i.l.bf16 %v2332_v30 }
 0x1a7   : > { %v1138_v17 = vmul.f32 %v1129_v14, %v2362_v44  ;;  %v2496_v18 = vmul.f32 %v1134_v16, %v2370_v47 }
 0x1a9   : > { %v1195_v29 = vmax.f32 %v1138_v17, %v2401_v4  ;;  %v1196_v23 = vmax.f32 %v2496_v18, %v2404_v6  ;;  %v1162_v24 = vpop.permute.xlu0 %1161  ;;  %v1156_v27 = vpop.permute.xlu1 %1155 }
 0x1aa   : > { %v1178_v28 = vsel %vm1177_vm2, %v1162_v24, %v1852_v21  ;;  %v1182_v20 = vsel %vm1177_vm2, %v1154_v63, %v1162_v24 }
 0x1ab   : > { %v1186_v53 = vmul.f32 %v1182_v20, %v2356_v42  ;;  %v1187_v62 = vmul.f32 %v1178_v28, %v2362_v44 }
 0x1ad   : > { %v1202_v3 = vmax.f32 %v1194_v9, %v1186_v53  ;;  %v1203_v7 = vmax.f32 %v1195_v29, %v1187_v62  ;;  %v1121_v10 = vpop.permute.xlu1 %1120  ;;  %v1115_v14 = vpop.permute.xlu0 %1114  ;;  %v1853_v29 = vunpack.i.h.bf16 %v2336_v32 }
 0x1ae   : > { %v1130_v16 = vsel %vm1128_vm1, %v1113_v11, %v1121_v10  ;;  %v1135_v59 = vsel %vm1128_vm1, %v1847_v2, %v1115_v14 }
 0x1af   : > { %v1230_v21 = vsub.f32 %v1137_v5, %v1202_v3  ;;  %v1231_v36 = vsub.f32 %v1138_v17, %v1203_v7  ;;  %v1322_v63 = vsub.f32 %v2396_v1, %v1202_v3  ;;  %v1323_v42 = vsub.f32 %v2401_v4, %v1203_v7 }
 0x1b0   : > { %v1394_v24 = vsub.f32 %v1186_v53, %v1202_v3  ;;  %v1395_v44 = vsub.f32 %v1187_v62, %v1203_v7  ;;  %v1140_v28 = vmul.f32 %v1130_v16, %v2378_v49  ;;  %v2518_v9 = vmul.f32 %v1135_v59, %v2382_v52 }
 0x1b1   : > { %v1238_v20 = vmul.f32 1.442695, %v1230_v21  ;;  %v1240_v11 = vmul.f32 1.442695, %v1231_v36  ;;  %v1330_v10 = vmul.f32 1.442695, %v1322_v63  ;;  %v1164_v57 = vpop.permute.xlu1 %1163  ;;  %v1158_v2 = vpop.permute.xlu0 %1157  ;;  %v1848_v3 = vunpack.i.h.bf16 %v2332_v30 }
 0x1b2   : > { %v1332_v5 = vmul.f32 1.442695, %v1323_v42  ;;  %v1402_v17 = vmul.f32 1.442695, %v1394_v24  ;;  %v1197_v1 = vmax.f32 %v1140_v28, %v2409_v8  ;;  %v1198_v4 = vmax.f32 %v2518_v9, %v2412_v13 }
 0x1b3   : > { %1885 = vpow2.f32 %v1238_v20  ;;  %v1179_v53 = vsel %vm1177_vm2, %v1164_v57, %v1853_v29  ;;  %v1183_v59 = vsel %vm1177_vm2, %v1156_v27, %v1164_v57  ;;  %v1404_v32 = vmul.f32 1.442695, %v1395_v44 }
 0x1b4   : > { %1887 = vpow2.f32 %v1240_v11  ;;  %v1188_v36 = vmul.f32 %v1183_v59, %v2370_v47  ;;  %v1189_v62 = vmul.f32 %v1179_v53, %v2378_v49  ;;  %v1857_v24 = vunpack.i.l.bf16 %v2334_v31 }
 0x1b5   : > { %1889 = vpow2.f32 %v1330_v10  ;;  %v1123_v7 = vpop.permute.xlu0 %1122  ;;  %v1117_v16 = vpop.permute.xlu1 %1116  ;;  %v1858_v53 = vunpack.i.h.bf16 %v2334_v31 }
 0x1b6   : > { %1891 = vpow2.f32 %v1332_v5  ;;  %v1204_v21 = vmax.f32 %v1196_v23, %v1188_v36  ;;  %v1205_v63 = vmax.f32 %v1197_v1, %v1189_v62  ;;  %v1131_v42 = vsel %vm1128_vm1, %v1115_v14, %v1123_v7 }
 0x1b7   : > { %1893 = vpow2.f32 %v1402_v17  ;;  %v1142_v57 = vmul.f32 %v1131_v42, %v2385_v54  ;;  %v1136_v47 = vsel %vm1128_vm1, %v1848_v3, %v1117_v16 }
 0x1b8   : > { %1895 = vpow2.f32 %v1404_v32  ;;  %v1232_v30 = vsub.f32 %v2496_v18, %v1204_v21  ;;  %v1233_v49 = vsub.f32 %v1140_v28, %v1205_v63  ;;  %v1324_v27 = vsub.f32 %v2404_v6, %v1204_v21 }
 0x1b9   : > { %v1325_v23 = vsub.f32 %v2409_v8, %v1205_v63  ;;  %v1396_v44 = vsub.f32 %v1188_v36, %v1204_v21  ;;  %v1397_v29 = vsub.f32 %v1189_v62, %v1205_v63  ;;  %v1199_v14 = vmax.f32 %v1142_v57, %v2417_v15  ;;  %v1166_v20 = vpop.permute.xlu0 %1165  ;;  %v1160_v11 = vpop.permute.xlu1 %1159 }
 0x1ba   : > { %v1242_v10 = vmul.f32 1.442695, %v1232_v30  ;;  %v1244_v5 = vmul.f32 1.442695, %v1233_v49  ;;  %v1334_v17 = vmul.f32 1.442695, %v1324_v27  ;;  %v2542_v1 = vmul.f32 %v1136_v47, %v2391_v58 }
 0x1bb   : > { %v1336_v18 = vmul.f32 1.442695, %v1325_v23  ;;  %v1406_v28 = vmul.f32 1.442695, %v1396_v44  ;;  %v1180_v6 = vsel %vm1177_vm2, %v1166_v20, %v1857_v24  ;;  %v1184_v59 = vsel %vm1177_vm2, %v1158_v2, %v1166_v20 }
 0x1bc   : > { %1897 = vpow2.f32 %v1242_v10  ;;  %v1200_v8 = vmax.f32 %v2542_v1, %v2420_v19  ;;  %v1191_v32 = vmul.f32 %v1180_v6, %v2385_v54  ;;  %v1863_v62 = vunpack.i.h.bf16 %v2340_v34 }
 0x1bd   : > { %v2552_v36 = vpop.eup %1885  ;;  %1899 = vpow2.f32 %v1244_v5  ;;  %v1408_v31 = vmul.f32 1.442695, %v1397_v29  ;;  %v1190_v3 = vmul.f32 %v1184_v59, %v2382_v52  ;;  %v1125_v7 = vpop.permute.xlu1 %1124  ;;  %v1370_v63 = vadd.f32 %v2350_v39, %v2427_v25 }
 0x1be   : > { %v2556_v21 = vpop.eup %1887  ;;  %1901 = vpow2.f32 %v1334_v17  ;;  %v1207_v42 = vmax.f32 %v1199_v14, %v1191_v32  ;;  %v1132_v2 = vsel %vm1128_vm1, %v1117_v16, %v1125_v7  ;;  %v1283_v24 = vsel %vm1128_vm1, %v1863_v62, %v2470_v51 }
 0x1bf   : > { %v1890_v54 = vpop.eup %1889  ;;  %1903 = vpow2.f32 %v1336_v18  ;;  %v1206_v47 = vmax.f32 %v1198_v4, %v1190_v3  ;;  %v1144_v52 = vmul.f32 %v1132_v2, %v2393_v60  ;;  %v1371_v14 = vadd.f32 %v2350_v39, %v2431_v26 }
 0x1c0   : > { %v1892_v30 = vpop.eup %1891  ;;  %v1346_v49 = vadd.f32 %v1890_v54, %v2552_v36  ;;  %1905 = vpow2.f32 %v1406_v28  ;;  %v1235_v27 = vsub.f32 %v1142_v57, %v1207_v42  ;;  %v1327_v25 = vsub.f32 %v2417_v15, %v1207_v42 }
 0x1c1   : > { %v2568_v23 = vpop.eup %1893  ;;  %v1347_v16 = vadd.f32 %v1892_v30, %v2556_v21  ;;  %1907 = vpow2.f32 %v1408_v31  ;;  %v1234_v44 = vsub.f32 %v2518_v9, %v1206_v47  ;;  %v1326_v51 = vsub.f32 %v2412_v13, %v1206_v47  ;;  %v1168_v29 = vpop.permute.xlu1 %1167 }
 0x1c2   : > { %v2573_v4 = vpop.eup %1895  ;;  %v1308_v20 = vadd.f32 %v2342_v35, %v1283_v24  ;;  %v2579_v57 = vadd.f32 %v2568_v23, %v1346_v49  ;;  %v1398_v15 = vsub.f32 %v1190_v3, %v1206_v47  ;;  %v1248_v17 = vmul.f32 1.442695, %v1235_v27 }
 0x1c3   : > { %v2582_v10 = vadd.f32 %v2573_v4, %v1347_v16  ;;  %v1246_v5 = vmul.f32 1.442695, %v1234_v44  ;;  %v1399_v9 = vsub.f32 %v1191_v32, %v1207_v42  ;;  %v1309_v13 = vadd.f32 %v2342_v35, %v2476_v56 }
 0x1c4   : > { %v1338_v18 = vmul.f32 1.442695, %v1326_v51  ;;  %v1201_v28 = vmax.f32 %v1144_v52, %v2425_v22  ;;  %v1181_v39 = vsel %vm1177_vm2, %v1168_v29, %v1858_v53  ;;  %v1340_v26 = vmul.f32 1.442695, %v1327_v25 }
 0x1c5   : > { %v1410_v6 = vmul.f32 1.442695, %v1398_v15  ;;  %v1185_v59 = vsel %vm1177_vm2, %v1160_v11, %v1168_v29  ;;  %v1193_v62 = vmul.f32 %v1181_v39, %v2393_v60  ;;  %1909 = vpow2.f32 %v1246_v5 }
 0x1c6   : > { %v1898_v31 = vpop.eup %1897  ;;  %v1192_v32 = vmul.f32 %v1185_v59, %v2391_v58  ;;  %v2593_v3 = vmul.f32 %v1890_v54, %v1370_v63  ;;  %v2595_v35 = vmul.f32 %v1892_v30, %v1371_v14  ;;  %1911 = vpow2.f32 %v1248_v17 }
 0x1c7   : > { %v1900_v56 = vpop.eup %1899  ;;  %v1412_v7 = vmul.f32 1.442695, %v1399_v9  ;;  %v1209_v42 = vmax.f32 %v1201_v28, %v1193_v62  ;;  %v1316_v53 = vmul.f32 %v1898_v31, %v1308_v20  ;;  %v1867_v24 = vunpack.i.l.bf16 %v2338_v33 }
 0x1c8   : > { %v1902_v2 = vpop.eup %1901  ;;  %1913 = vpow2.f32 %v1338_v18  ;;  %v1208_v11 = vmax.f32 %v1200_v8, %v1192_v32  ;;  %v1317_v47 = vmul.f32 %v1900_v56, %v1309_v13  ;;  %v1372_v8 = vadd.f32 %v2352_v40, %v2358_v43 }
 0x1c9   : > { %v1904_v60 = vpop.eup %1903  ;;  %v1348_v49 = vadd.f32 %v1902_v2, %v1898_v31  ;;  %1915 = vpow2.f32 %v1340_v26  ;;  %v1237_v27 = vsub.f32 %v1144_v52, %v1209_v42  ;;  %v1329_v58 = vsub.f32 %v2425_v22, %v1209_v42 }
 0x1ca   : > { %v2599_v63 = vpop.eup %1905  ;;  %v1349_v54 = vadd.f32 %v1904_v60, %v1900_v56  ;;  %1917 = vpow2.f32 %v1410_v6  ;;  %v1236_v30 = vsub.f32 %v2542_v1, %v1208_v11  ;;  %v1328_v25 = vsub.f32 %v2420_v19, %v1208_v11  ;;  %v2603_v16 = vpop.permute.xlu0 %1471 }
 0x1cb   : > { %v2605_v44 = vpop.eup %1907  ;;  %v1284_v52 = vsel %vm1128_vm1, %v1867_v24, %v2480_v61  ;;  %v1420_v22 = vadd.f32 %v2599_v63, %v1348_v49  ;;  %1919 = vpow2.f32 %v1412_v7  ;;  %v1252_v29 = vmul.f32 1.442695, %v1237_v27 }
 0x1cc   : > { %v2614_v51 = vadd.f32 %v2605_v44, %v1349_v54  ;;  %v1250_v1 = vmul.f32 1.442695, %v1236_v30  ;;  %v1400_v19 = vsub.f32 %v1192_v32, %v1208_v11  ;;  %v1342_v14 = vmul.f32 1.442695, %v1328_v25 }
 0x1cd   : > { %v1401_v20 = vsub.f32 %v1193_v62, %v1209_v42  ;;  %v1380_v15 = vmul.f32 %v1902_v2, %v1372_v8  ;;  %v1381_v5 = vmul.f32 %v1904_v60, %v2368_v46  ;;  %v1344_v17 = vmul.f32 1.442695, %v1329_v58 }
 0x1ce   : > { %v1277_v40 = vpop.permute.xlu0 %1276  ;;  %v1310_v43 = vadd.f32 %v2346_v37, %v1284_v52  ;;  %1921 = vpow2.f32 %v1250_v1  ;;  %v1414_v9 = vmul.f32 1.442695, %v1400_v19  ;;  %v1374_v6 = vadd.f32 %v2354_v41, %v2372_v48 }
 0x1cf   : > { %v2618_v13 = vadd.f32 %v1380_v15, %v1316_v53  ;;  %v1910_v18 = vpop.eup %1909  ;;  %1923 = vpow2.f32 %v1252_v29  ;;  %v1416_v28 = vmul.f32 1.442695, %v1401_v20  ;;  %v2620_v39 = vadd.f32 %v1381_v5, %v1317_v47 }
 0x1d0   : > { %v1912_v26 = vpop.eup %1911  ;;  %1925 = vpow2.f32 %v1342_v14  ;;  %v1318_v59 = vmul.f32 %v1910_v18, %v1310_v43  ;;  %v1375_v62 = vadd.f32 %v2354_v41, %v2380_v50  ;;  %v1868_v7 = vunpack.i.h.bf16 %v2338_v33  ;;  %v2792_v43 = vld [vmem:[#allocation11_spill] sm:$0xff] }
 0x1d1   : > { %1927 = vpow2.f32 %v1344_v17  ;;  %v1281_v33 = vsel %vm1128_vm1, %v2482_v0, %v1277_v40 }
 0x1d2   : > { %v1914_v46 = vpop.eup %1913  ;;  %v1429_v31 = vpop.permute.xlu0 %1428  ;;  %1929 = vpow2.f32 %v1414_v9  ;;  %v1285_v41 = vsel %vm1128_vm1, %v1868_v7, %v2482_v0  ;;  %v1313_v8 = vadd.f32 %v2348_v38, %v1281_v33 }
 0x1d3   : > { %v2626_v32 = vpop.permute.xlu1 %1467  ;;  %v1916_v56 = vpop.eup %1915  ;;  %v1350_v42 = vadd.f32 %v1914_v46, %v1910_v18  ;;  %v1382_v53 = vmul.f32 %v1914_v46, %v1374_v6  ;;  %1931 = vpow2.f32 %v1416_v28  ;;  %v1312_v54 = vadd.f32 %v2348_v38, %v1285_v41 }
 0x1d4   : > { %v1918_v2 = vpop.eup %1917  ;;  %v1351_v24 = vadd.f32 %v1916_v56, %v1912_v26  ;;  %v1383_v48 = vmul.f32 %v1916_v56, %v1375_v62  ;;  %1933 = vrcp.f32 %v1420_v22 }
 0x1d5   : > { %v2629_v11 = vpop.eup %1919  ;;  %v1422_v50 = vadd.f32 %v1918_v2, %v1350_v42  ;;  %v1390_v47 = vadd.f32 %v1382_v53, %v1318_v59 }
 0x1d6   : > { %v2635_v60 = vadd.f32 %v2629_v11, %v1351_v24  ;;  %v1433_v49 = vpop.permute.xlu0 %1432  ;;  %v1862_v24 = vunpack.i.l.bf16 %v2340_v34 }
 0x1d7   : > { %v1275_v27 = vpop.permute.xlu1 %1274  ;;  %1935 = vrcp.f32 %v1422_v50 }
 0x1d8   : > { %v1280_v58 = vsel %vm1128_vm1, %v2480_v61, %v1275_v27  ;;  %v1922_v25 = vpop.eup %1921 }
 0x1d9   : > { %v1311_v30 = vadd.f32 %v2346_v37, %v1280_v58  ;;  %v1924_v52 = vpop.eup %1923  ;;  %v1320_v0 = vmul.f32 %v1922_v25, %v1312_v54  ;;  %v2793_v54 = vld [vmem:[#allocation10_spill] sm:$0xff] }
 0x1da   : > { %v2646_v29 = vpop.permute.xlu0 %1436  ;;  %v1926_v14 = vpop.eup %1925  ;;  %v1321_v22 = vmul.f32 %v1924_v52, %v1313_v8 }
 0x1db   : > { %v1319_v1 = vmul.f32 %v1912_v26, %v1311_v30  ;;  %v1431_v19 = vpop.permute.xlu1 %1430  ;;  %v1455_v61 = vsel %vm1177_vm2, %v1429_v31, %v2646_v29  ;;  %v1928_v20 = vpop.eup %1927  ;;  %v1352_v15 = vadd.f32 %v1926_v14, %v1922_v25  ;;  %v1384_v5 = vmul.f32 %v1926_v14, %v2387_v55 }
 0x1dc   : > { %v1476_v38 = vadd.f32 %v2466_v12, %v1455_v61  ;;  %v1930_v17 = vpop.eup %1929  ;;  %v1353_v40 = vadd.f32 %v1928_v20, %v1924_v52  ;;  %v1385_v9 = vmul.f32 %v1928_v20, %v2792_v43 }
 0x1dd   : > { %v2651_v37 = vadd.f32 %v1383_v48, %v1319_v1  ;;  %v2656_v18 = vpop.eup %1931  ;;  %v1424_v28 = vadd.f32 %v1930_v17, %v1352_v15  ;;  %v1392_v59 = vadd.f32 %v1384_v5, %v1320_v0 }
 0x1de   : > { %v1484_v26 = vmul.f32 %v2599_v63, %v1476_v38  ;;  %v1441_v6 = vpop.permute.xlu0 %1440  ;;  %v1425_v62 = vadd.f32 %v2656_v18, %v1353_v40  ;;  %v2661_v31 = vadd.f32 %v1385_v9, %v1321_v22  ;;  %v1934_v53 = vpop.eup %1933 }
 0x1df   : > { %v1439_v46 = vpop.permute.xlu1 %1438  ;;  %v1457_v55 = vsel %vm1177_vm2, %v1433_v49, %v1441_v6  ;;  %1937 = vrcp.f32 %v1424_v28 }
 0x1e0   : > { %v1456_v56 = vsel %vm1177_vm2, %v1431_v19, %v1439_v46  ;;  %v1492_v7 = vadd.f32 %v1484_v26, %v2618_v13  ;;  %v1480_v42 = vadd.f32 %v2603_v16, %v1457_v55  ;;  %1939 = vrcp.f32 %v2579_v57  ;;  %v2794_v19 = vld [vmem:[#allocation12_spill] sm:$0xff] }
 0x1e1   : > { %v1478_v63 = vadd.f32 %v2626_v32, %v1456_v56  ;;  %v1936_v34 = vpop.eup %1935  ;;  %1941 = vrcp.f32 %v2582_v10 }
 0x1e2   : > { %v1508_v48 = vmul.f32 %v1934_v53, %v1492_v7  ;;  %v1488_v41 = vmul.f32 %v1930_v17, %v1480_v42  ;;  %v1263_v27 = vpop.permute.xlu0 %1262  ;;  %1943 = vrcp.f32 %v2614_v51 }
 0x1e3   : > { %v1486_v50 = vmul.f32 %v1918_v2, %v1478_v63  ;;  %v1427_v33 = vpop.permute.xlu1 %1426  ;;  %v1282_v49 = vsel %vm1128_vm1, %v1862_v24, %v1263_v27  ;;  %1945 = vrcp.f32 %v1425_v62 }
 0x1e4   : > { %1516 = vst [vmem:[%s2674_s16 + $0x10] sm:$0xff] %v1508_v48  ;;  %v1496_v13 = vadd.f32 %v1488_v41, %v1392_v59  ;;  %v1306_v30 = vadd.f32 %v2793_v54, %v1282_v49  ;;  %1947 = vrcp.f32 %v2635_v60 }
 0x1e5   : > { %v1494_v58 = vadd.f32 %v1486_v50, %v1390_v47 }
 0x1e6   : > { %v1314_v2 = vmul.f32 %v2552_v36, %v1306_v30  ;;  %v1271_v52 = vpop.permute.xlu0 %1270 }
 0x1e7   : > { %v1510_v25 = vmul.f32 %v1936_v34, %v1494_v58  ;;  %v1435_v8 = vpop.permute.xlu1 %1434  ;;  %v1278_v1 = vsel %vm1128_vm1, %v1263_v27, %v1271_v52 }
 0x1e8   : > { %v1454_v57 = vsel %vm1177_vm2, %v1427_v33, %v1435_v8  ;;  %v1386_v47 = vadd.f32 %v2593_v3, %v1314_v2  ;;  %v1307_v14 = vadd.f32 %v2793_v54, %v1278_v1 }
 0x1e9   : > { %1518 = vst [vmem:[%s2674_s16 + $0x20] sm:$0xff] %v1510_v25  ;;  %v1474_v0 = vadd.f32 %v2794_v19, %v1454_v57  ;;  %v1938_v36 = vpop.eup %1937 }
 0x1ea   : > { %v1315_v22 = vmul.f32 %v2556_v21, %v1307_v14  ;;  %v1882_v20 = vpop.permute.xlu0 %1881  ;;  %v1512_v15 = vmul.f32 %v1938_v36, %v1496_v13  ;;  %v1940_v43 = vpop.eup %1939 }
 0x1eb   : > { %v1482_v10 = vmul.f32 %v2568_v23, %v1474_v0  ;;  %v1877_v61 = vpop.permute.xlu1 %1876  ;;  %v1884_v3 = vunpack.i.h.bf16 %v1882_v20  ;;  %v1883_v40 = vunpack.i.l.bf16 %v1882_v20  ;;  %v1942_v56 = vpop.eup %1941 }
 0x1ec   : > { %v1879_v51 = vunpack.i.h.bf16 %v1877_v61  ;;  %v1878_v38 = vunpack.i.l.bf16 %v1877_v61  ;;  %v1387_v17 = vadd.f32 %v2595_v35, %v1315_v22  ;;  %1520 = vst [vmem:[%s2674_s16 + $0x30] sm:$0xff] %v1512_v15 }
 0x1ed   : > { %v1490_v5 = vadd.f32 %v1482_v10, %v1386_v47  ;;  %v1453_v23 = vsel %vm1177_vm2, %v1441_v6, %v1884_v3  ;;  %v1452_v59 = vsel %vm1177_vm2, %v1439_v46, %v1883_v40 }
 0x1ee   : > { %v1451_v60 = vsel %vm1177_vm2, %v2646_v29, %v1879_v51  ;;  %v1450_v21 = vsel %vm1177_vm2, %v1435_v8, %v1878_v38  ;;  %v1481_v26 = vadd.f32 %v2603_v16, %v1453_v23  ;;  %v1479_v6 = vadd.f32 %v2626_v32, %v1452_v59 }
 0x1ef   : > { %v1506_v9 = vmul.f32 %v1940_v43, %v1490_v5  ;;  %v1477_v28 = vadd.f32 %v2466_v12, %v1451_v60  ;;  %v1475_v35 = vadd.f32 %v2794_v19, %v1450_v21  ;;  %v1944_v12 = vpop.eup %1943 }
 0x1f0   : > { %v1489_v55 = vmul.f32 %v2656_v18, %v1481_v26  ;;  %v1487_v46 = vmul.f32 %v2629_v11, %v1479_v6 }
 0x1f1   : > { %1514 = vst [vmem:[%s2674_s16] sm:$0xff] %v1506_v9  ;;  %v1485_v29 = vmul.f32 %v2605_v44, %v1477_v28  ;;  %v1483_v62 = vmul.f32 %v2573_v4, %v1475_v35  ;;  %v1946_v4 = vpop.eup %1945 }
 0x1f2   : > { %v1497_v45 = vadd.f32 %v1489_v55, %v2661_v31  ;;  %v1948_v44 = vpop.eup %1947  ;;  %v1495_v63 = vadd.f32 %v1487_v46, %v2651_v37 }
 0x1f3   : > { %v1493_v7 = vadd.f32 %v1485_v29, %v2620_v39  ;;  %v1491_v16 = vadd.f32 %v1483_v62, %v1387_v17 }
 0x1f4   : > { %v1513_v42 = vmul.f32 %v1946_v4, %v1497_v45  ;;  %v1511_v39 = vmul.f32 %v1948_v44, %v1495_v63 }
 0x1f5   : > { %v1509_v32 = vmul.f32 %v1944_v12, %v1493_v7  ;;  %v1507_v18 = vmul.f32 %v1942_v56, %v1491_v16 }
 0x1f6   : > { %1521 = vst [vmem:[%s2674_s16 + $0x38] sm:$0xff] %v1513_v42  ;;  %1519 = vst [vmem:[%s2674_s16 + $0x28] sm:$0xff] %v1511_v39 }
 0x1f7   : > { %1517 = vst [vmem:[%s2674_s16 + $0x18] sm:$0xff] %v1509_v32  ;;  %1515 = vst [vmem:[%s2674_s16 + $0x8] sm:$0xff] %v1507_v18 }
 0x1f8   : > { %1990 = shalt.err (!%p1987_p0)
}
 0x1f9   : > { %s1991_s15 = scalar_lea.hbm %s2720_s8, 1024  ;;  %s1995_s28 = scalar_lea.hbm %s2780_s5, 2048 }
 0x1fa   : > { %p1992_p2 = scmp.ne.s32.totalorder %s2720_s8, %s1991_s15  ;;  %p1996_p5 = scmp.lt.u32.totalorder %s2720_s8, %s2780_s5 }
 0x1fb   : > { %p1997_p6 = scmp.lt.u32.totalorder %s1995_s28, %s1991_s15  ;;  %p1999_p8 = scmp.lt.u32.totalorder %s1991_s15, %s2720_s8 }
 0x1fc   : > { %p1993_p3 = pnand %p1992_p2, %p2795_p9 }
 0x1fd   : > { %p1998_p4 = por %p1997_p6, %p1996_p5 }
 0x1fe   : > { %p1994_p1 = pneg %p1993_p3 }
 0x1ff   : > { %p2000_p11 = por %p1999_p8, %p1998_p4 }
 0x201   : > { %p2001_p12 = pnand %p2000_p11, %p1994_p1 }
 0x203   : > { %2004 = shalt.err (!%p2001_p12)
}
 0x204   : > { %s2072_s9 = smov 256   ;;  %s2073_s29 = smov 16  }
 0x205   : > { %1773 = dma.vmem_to_hbm [thread:$0]  (%p2795_p9), %s2722_s27, 1024, %s2720_s8, %s1523_s20, %s2072_s9, %s2072_s9, %s2073_s29  }
 0x206 PF: > { %s1553_s17 = sand.u32 1, %s2039_s0   ;;  %p2796_p7 = scmp.ne.s32.totalorder %s2788_s7, 0 }
 0x207   : > { %p2797_p10 = scmp.ge.s32.totalorder %s2059_s22, 2  ;;  %s1554_s10 = scalar_lea.sflag [#allocation6], %s1553_s17 }
 0x209   : > { %p1776_p13 = pnand %p2797_p10, %p2796_p7 }
 0x20b   : > { %2034 = dma.done.wait (!%p1776_p13), %s1554_s10, 1024  }
 0x20c   : > { %2036 = vsyncadd (!%p1776_p13), %s1554_s10, 4294966272  ;;  %s21_s22 = sadd.s32 1, %s2059_s22   ;;  %s2798_s0 = smov %s2043_s18 }
 0x20d   : > { %p18_p0 = scmp.ge.s32.totalorder %s21_s22, 4   ;;  %s2799_s18 = smov %s2047_s19 }
 0x20e   : > { %s2800_s19 = smov %s2160_s6  ;;  %s2801_s20 = smov %s2055_s21 }
 0x20f   : > { %s2802_s21 = smov %s2804_s25  ;;  %20 = sbr.rel (!%p18_p0) target bundleno = 6 (0x6), region = 146 }
 0x216   :  { %1559 = vsyncpa [#allocation5], 1 }
 0x217   :  { %1561 = vsyncpa [#allocation5 + $0x1], 1 }
 0x218   :  { %1562 = vsyncpa [#allocation6], 1 }
 0x219   :  { %1564 = vsyncpa [#allocation6 + $0x1], 1 }

</bundles_post_ra>
